<compile_context>
chip_gen: v6e
topology: v6e:2x2x1
jax: 0.10.0
libtpu: 0.0.40
codegen_flags: <defaults>
</compile_context>

<pallas_src>
import functools

import jax
import jax.numpy as jnp
from jax.experimental import pallas as pl
from jax.experimental.pallas import tpu as pltpu

BF16 = jnp.bfloat16


def _bdot(a, b):
  """MXU matmul: bf16 operands, f32 accumulation."""
  return jnp.dot(a.astype(BF16), b.astype(BF16),
                 preferred_element_type=jnp.float32)


# ----------------------------------------------------------------------------
# Kernels
# ----------------------------------------------------------------------------
def _mu_kernel(a_ref, x_ref, mu_ref, *, fin, shared_input):
  """Pass 1 of a layer: mu[rows] = A_norm[rows, :] @ x0  (mean aggregation).

  Runs as its own row-tiled pallas_call because the centred second moment
  sigma = A @ (x1 - mu)^2 consumes mu at *source* nodes, i.e. needs all N rows
  of mu before any destination row tile of sigma can be aggregated.
  """
  if shared_input:
    x0 = x_ref[...]                          # [N, fin] (layer 1: raw features)
  else:
    x0 = x_ref[...][:, :fin]                 # first moment's lanes of the slab
  mu_ref[...] = _bdot(a_ref[...], x0)


def _layer_kernel(a_ref, x_ref, *rest, moment, fin, tile_rows,
                  shared_input, num_classes):
  """Pass 2: higher-moment aggregation + block-diag linears + ReLU (+ fused head)."""
  idx = 0
  if moment >= 2:
    mu_ref = rest[idx]; idx += 1
  wl_ref = rest[idx]; wr_ref = rest[idx + 1]; b_ref = rest[idx + 2]; idx += 3
  if num_classes is not None:
    wout_ref = rest[idx]; idx += 1
  o_ref = rest[idx]

  r0 = pl.multiple_of(pl.program_id(0) * tile_rows, 8)
  x_rows = x_ref[pl.ds(r0, tile_rows), :]    # root-weight inputs for this tile

  if moment >= 2:
    mu_full = mu_ref[...]                    # [N, fin]  (all source nodes)
    mu_rows = mu_ref[pl.ds(r0, tile_rows), :]
    if shared_input:
      x_full = x_ref[...]
      xm = lambda m: x_full                  # layer 1: every moment sees raw x
    else:
      slab = x_ref[...]
      xm = lambda m: slab[:, m * fin:(m + 1) * fin]

    # Fuse all mu-independent aggregations into ONE A-matmul (lane-concat RHS).
    parts = [(xm(1) - mu_full) ** 2]
    for order in range(3, moment + 1):
      parts.append(xm(order - 1) ** order)
    rhs = parts[0] if len(parts) == 1 else jnp.concatenate(parts, axis=-1)
    hi = _bdot(a_ref[...], rhs)              # [TM, (moment-1)*fin]

    sigma = hi[:, :fin]
    sigma = jnp.sqrt(jnp.where(sigma == 0.0, jnp.float32(1e-16), sigma))
    aggs = [mu_rows, sigma]
    for order in range(3, moment + 1):
      g = hi[:, (order - 2) * fin:(order - 1) * fin]
      g = jnp.where(g == 0.0, jnp.float32(1e-16), g)
      aggs.append(jnp.sign(g) * jnp.abs(g) ** (1.0 / order))
    agg_rows = jnp.concatenate(aggs, axis=-1)  # [TM, moment*fin]
  else:
    x0 = x_ref[...] if shared_input else x_ref[...][:, :fin]
    agg_rows = _bdot(a_ref[...], x0)           # [TM, fin]

  # All M per-moment linears in one push each: block-diag Wl / Wr packed on host.
  h = _bdot(agg_rows, wl_ref[...]) + _bdot(x_rows, wr_ref[...]) + b_ref[...]
  h = jnp.maximum(h, 0.0)      # ReLU; dropout(p=0.5) is the eval-mode identity

  if num_classes is None:
    o_ref[...] = h                             # lane-dense slab [TM, moment*H]
  else:
    logits = _bdot(h, wout_ref[...])           # [TM, Cp] lane-dense padded head
    col = jax.lax.broadcasted_iota(jnp.int32, logits.shape, 1)
    valid = col < num_classes
    mx = jnp.max(jnp.where(valid, logits, jnp.float32(-1e30)),
                 axis=-1, keepdims=True)
    z = logits - mx
    lse = jnp.log(jnp.sum(jnp.where(valid, jnp.exp(z), 0.0),
                          axis=-1, keepdims=True))
    o_ref[...] = jnp.where(valid, z - lse, 0.0)


# ----------------------------------------------------------------------------
# Host wrapper
# ----------------------------------------------------------------------------
def _pick_row_tile(n):
  for tm in (512, 256, 128, 64, 32, 16):
    if n % tm == 0:
      return tm
  return n                       # small / odd N: single full row block


def _block_diag(w):
  """[M, fin, h] -> block-diagonal [M*fin, M*h]."""
  m, fin, h = w.shape
  out = jnp.zeros((m * fin, m * h), w.dtype)
  for i in range(m):
    out = out.at[i * fin:(i + 1) * fin, i * h:(i + 1) * h].set(w[i])
  return out


def graphsage_moment_split_forward(x, A_norm, params, moment):
  """Full model forward. x: [N, F]; A_norm: [N, N] row-normalized adjacency."""
  N, _ = x.shape
  layers = params["layers"]
  num_layers = len(layers)
  hidden = layers[0][0].shape[-1]
  C = params["out_w"].shape[-1]
  Cp = pl.cdiv(C, 128) * 128
  TM = _pick_row_tile(N)
  nt = N // TM

  A16 = A_norm.astype(BF16)              # bf16 halves the N^2 HBM/VMEM footprint
  W_out = params["out_w"]
  W_out_p = jnp.zeros((W_out.shape[0], Cp), BF16).at[:, :C].set(
      W_out.astype(BF16))

  cparams = pltpu.CompilerParams(dimension_semantics=("parallel",))
  a_spec = pl.BlockSpec((TM, N), lambda i: (i, 0))   # streamed A row tiles

  h = x.astype(jnp.float32)
  for l, (Wl, bl, Wr) in enumerate(layers):
    fin = Wl.shape[1]
    shared = (l == 0)                 # layer 1: all moments share the raw x
    is_last = (l == num_layers - 1)
    in_w = fin if shared else moment * fin

    wl_bd = _block_diag(Wl).astype(BF16)                       # [M*fin, M*H]
    if shared:
      wr_p = jnp.concatenate([Wr[m] for m in range(moment)],
                             axis=1).astype(BF16)              # [fin, M*H]
    else:
      wr_p = _block_diag(Wr).astype(BF16)                      # [M*fin, M*H]
    b_cat = bl.reshape(1, moment * hidden).astype(jnp.float32)

    x_spec = pl.BlockSpec((N, in_w), lambda i: (0, 0))         # resident features

    mu = None
    if moment >= 2:
      mu = pl.pallas_call(
          functools.partial(_mu_kernel, fin=fin, shared_input=shared),
          grid=(nt,),
          in_specs=[a_spec, x_spec],
          out_specs=pl.BlockSpec((TM, fin), lambda i: (i, 0)),
          out_shape=jax.ShapeDtypeStruct((N, fin), jnp.float32),
          compiler_params=cparams,
      )(A16, h)

    out_w = Cp if is_last else moment * hidden
    inputs = [A16, h]
    in_specs = [a_spec, x_spec]
    if moment >= 2:
      inputs.append(mu)
      in_specs.append(pl.BlockSpec((N, fin), lambda i: (0, 0)))
    inputs += [wl_bd, wr_p, b_cat]
    in_specs += [pl.BlockSpec(wl_bd.shape, lambda i: (0, 0)),
                 pl.BlockSpec(wr_p.shape, lambda i: (0, 0)),
                 pl.BlockSpec(b_cat.shape, lambda i: (0, 0))]
    if is_last:
      inputs.append(W_out_p)
      in_specs.append(pl.BlockSpec(W_out_p.shape, lambda i: (0, 0)))

    kern = functools.partial(
        _layer_kernel, moment=moment, fin=fin, tile_rows=TM,
        shared_input=shared, num_classes=(C if is_last else None))
    h = pl.pallas_call(
        kern,
        grid=(nt,),
        in_specs=in_specs,
        out_specs=pl.BlockSpec((TM, out_w), lambda i: (i, 0)),
        out_shape=jax.ShapeDtypeStruct((N, out_w), jnp.float32),
        compiler_params=cparams,
    )(*inputs)

  return h[:, :C]


# ----------------------------------------------------------------------------
# Pure-JAX reference (dot_fn selects f32 or mirrored bf16-MXU precision)
# ----------------------------------------------------------------------------
def _ref_forward(x, A, params, moment, dot):
  xs = [x] * moment
  for (Wl, bl, Wr) in params["layers"]:
    mu = dot(A, xs[0])
    aggs = [mu]
    if moment >= 2:
      s = dot(A, (xs[1] - mu) ** 2)
      s = jnp.where(s == 0.0, 1e-16, s)
      aggs.append(jnp.sqrt(s))
      for order in range(3, moment + 1):
        g = dot(A, xs[order - 1] ** order)
        g = jnp.where(g == 0.0, 1e-16, g)
        aggs.append(jnp.sign(g) * jnp.abs(g) ** (1.0 / order))
    xs = [jnp.maximum(dot(aggs[m], Wl[m]) + bl[m] + dot(xs[m], Wr[m]), 0.0)
          for m in range(moment)]
  h_cat = jnp.concatenate(xs, axis=-1)
  logits = dot(h_cat, params["out_w"])
  return jax.nn.log_softmax(logits, axis=1)


# ----------------------------------------------------------------------------
# Deterministic parameter / input construction
# ----------------------------------------------------------------------------
def _linear_w(key, fan_in, fan_out):
  bound = 1.0 / jnp.sqrt(jnp.float32(fan_in))
  return jax.random.uniform(key, (fan_in, fan_out), jnp.float32, -bound, bound)


def make_params(key, num_features, hidden, num_classes, moment, layer_num):
  layers = []
  for l in range(layer_num):
    f_in = num_features if l == 0 else hidden
    kWl, kbl, kWr, key = jax.random.split(key, 4)
    Wl = jnp.stack([_linear_w(k, f_in, hidden)
                    for k in jax.random.split(kWl, moment)])
    bl = jax.random.uniform(kbl, (moment, 1, hidden), jnp.float32,
                            -1.0 / jnp.sqrt(f_in), 1.0 / jnp.sqrt(f_in))
    Wr = jnp.stack([_linear_w(k, f_in, hidden)
                    for k in jax.random.split(kWr, moment)])
    layers.append((Wl, bl, Wr))
  out_w = _linear_w(key, hidden * moment, num_classes)
  return {"layers": layers, "out_w": out_w}


def make_graph(key, N, extra_edges):
  # ring (guarantees every row has >=1 neighbor) + random extra edges
  ring_r = jnp.arange(N)
  ring_c = (ring_r + 1) % N
  kr, kc = jax.random.split(key)
  rr = jax.random.randint(kr, (extra_edges,), 0, N)
  rc = jax.random.randint(kc, (extra_edges,), 0, N)
  row = jnp.concatenate([ring_r, rr])
  col = jnp.concatenate([ring_c, rc])
  A = jnp.zeros((N, N), jnp.float32).at[row, col].set(1.0)
  deg = jnp.sum(A, axis=1, keepdims=True)
  A_norm = A / jnp.maximum(deg, 1.0)        # mean aggregation
  return jnp.stack([row, col]), A_norm


# ----------------------------------------------------------------------------
if __name__ == "__main__":
  N, num_features, hidden, num_classes = 64, 32, 32, 8
  moment, layer_num = 2, 2

  key = jax.random.PRNGKey(0)
  kx, kg, kp = jax.random.split(key, 3)

  x = jax.random.normal(kx, (N, num_features), jnp.float32)
  edge_index, A_norm = make_graph(kg, N, extra_edges=192)
  params = make_params(kp, num_features, hidden, num_classes, moment, layer_num)

  out = graphsage_moment_split_forward(x, A_norm, params, moment)
  out = jax.block_until_ready(out)
  assert out.shape == (N, num_classes)

  # Mirrored reference: identical math with the same bf16-in / f32-acc matmuls.
  ref16 = jax.block_until_ready(_ref_forward(x, A_norm, params, moment, dot=_bdot))
  assert jnp.allclose(out, ref16, atol=5e-3, rtol=5e-3), "mismatch vs bf16-MXU reference"

  # Loose sanity check vs a full-f32 reference (bf16 MXU operands only add small
  # rounding; any wiring bug would show up as O(1) errors).
  f32dot = lambda a, b: jnp.dot(a, b, preferred_element_type=jnp.float32)
  ref32 = jax.block_until_ready(_ref_forward(x, A_norm, params, moment, dot=f32dot))
  assert jnp.allclose(out, ref32, atol=0.25, rtol=0.0), "mismatch vs f32 reference"

  print("KERNEL_OK")
</pallas_src>

<mosaic_0001>
module attributes {stable_mosaic.version = 11 : i64} {
  func.func @_mu_kernel(%arg0: i32, %arg1: memref<64x64xbf16, #tpu.memory_space<vmem>>, %arg2: memref<64x32xf32, #tpu.memory_space<vmem>>, %arg3: memref<64x32xf32, #tpu.memory_space<vmem>>) attributes {dimension_semantics = [#tpu.dimension_semantics<parallel>], iteration_bounds = array<i64: 1>, scalar_prefetch = 0 : i64, scratch_operands = 0 : i64, tpu.core_type = #tpu.core_type<tc>, window_params = [{transform_indices = @transform_0, window_bounds = array<i64: 64, 64>}, {pipeline_mode = #tpu.pipeline_mode<synchronous>, transform_indices = @transform_1, window_bounds = array<i64: 64, 32>}, {transform_indices = @transform_2, window_bounds = array<i64: 64, 32>}]} {
    %c0 = arith.constant 0 : index
    %c0_0 = arith.constant 0 : index
    %0 = vector.load %arg2[%c0, %c0_0] : memref<64x32xf32, #tpu.memory_space<vmem>>, vector<64x32xf32>
    %c0_1 = arith.constant 0 : index
    %c0_2 = arith.constant 0 : index
    %1 = vector.load %arg1[%c0_1, %c0_2] : memref<64x64xbf16, #tpu.memory_space<vmem>>, vector<64x64xbf16>
    %2 = arith.truncf %0 : vector<64x32xf32> to vector<64x32xbf16>
    %cst = arith.constant dense<0.000000e+00> : vector<64x32xf32>
    %3 = tpu.matmul %1, %2, %cst {dimension_numbers = #tpu.dot_dimension_numbers<[1], [0], [0], [1], [0, 0, 1, 1], [], []>} : vector<64x64xbf16>, vector<64x32xbf16>, vector<64x32xf32> -> vector<64x32xf32>
    %c0_3 = arith.constant 0 : index
    %c0_4 = arith.constant 0 : index
    %4 = vector.load %arg3[%c0_3, %c0_4] : memref<64x32xf32, #tpu.memory_space<vmem>>, vector<64x32xf32>
    tpu.vector_store %arg3[%c0_3, %c0_4], %3 {strides = array<i32>} : memref<64x32xf32, #tpu.memory_space<vmem>>, vector<64x32xf32>,
    return
  }
  func.func @transform_0(%arg0: i32) -> (i32, i32) {
    %c0_i32 = arith.constant 0 : i32
    %c0_i32_0 = arith.constant 0 : i32
    return %arg0, %c0_i32 : i32, i32
  }
  func.func @transform_1(%arg0: i32) -> (i32, i32) {
    %c0_i32 = arith.constant 0 : i32
    %c0_i32_0 = arith.constant 0 : i32
    %c0_i32_1 = arith.constant 0 : i32
    return %c0_i32, %c0_i32_0 : i32, i32
  }
  func.func @transform_2(%arg0: i32) -> (i32, i32) {
    %c0_i32 = arith.constant 0 : i32
    %c0_i32_0 = arith.constant 0 : i32
    return %arg0, %c0_i32 : i32, i32
  }
}

</mosaic_0001>

<bundles_post_ra>
// kernel: tpu_custom_call.1
= control target key start
LH: loop header
LB: loop body
LE: loop exit
PB: predicated region body
PF: predicated region fallthrough
CT: control target
= control target key end

     0   :  { %vm52_vm0 = vcmask 523264   ;;  %vm130_vm1 = vcmask 261120   ;;  %s274_s1 = inlined_call_operand.vmem [shape: f32[64,32], index: 1, kind: input, shape index: {}]   ;;  %s275_s0 = inlined_call_operand.vmem [shape: bf16[64,64], index: 0, kind: input, shape index: {}]   ;;  %s276_s2 = inlined_call_operand.vmem [shape: f32[64,32], index: 2, kind: output, shape index: {}]  }
   0x1   :  { %v18_v0 = vld [vmem:[%s274_s1 + $0x30] sm:$0xff]  ;;  %v19_v1 = vld [vmem:[%s274_s1 + $0x38] sm:$0xff]  ;;  %v16_v2 = vld [vmem:[%s274_s1 + $0x20] sm:$0xff] }
   0x2   :  { %v31_v3 = vpack.c.bf16 %v19_v1, %v18_v0  ;;  %v17_v4 = vld [vmem:[%s274_s1 + $0x28] sm:$0xff]  ;;  %v14_v6 = vld [vmem:[%s274_s1 + $0x10] sm:$0xff]  ;;  %v15_v7 = vld [vmem:[%s274_s1 + $0x18] sm:$0xff] }
   0x3   :  { %v30_v5 = vpack.c.bf16 %v17_v4, %v16_v2  ;;  %v183_v8 = vld [vmem:[%s275_s0] sm:$0xff]   ;;  %v184_v9 = vld [vmem:[%s275_s0 + $0x10] sm:$0xff]   ;;  %v29_v10 = vpack.c.bf16 %v15_v7, %v14_v6  ;;  %v13_v12 = vld [vmem:[%s274_s1 + $0x8] sm:$0xff] }
   0x4   :  { %159 = vmatprep.subr.bf16.mxu0 %v31_v3  ;;  %175 = vmatprep.subr.bf16.mxu1 %v31_v3  ;;  %v12_v11 = vld [vmem:[%s274_s1] sm:$0xff]  ;;  %v185_v14 = vld [vmem:[%s275_s0 + $0x8] sm:$0xff]   ;;  %v186_v15 = vld [vmem:[%s275_s0 + $0x18] sm:$0xff]  }
   0x5   :  { %160 = vmatpush3.bf16.msra.mxu0 %v31_v3  ;;  %179 = vmatpush3.bf16.msra.mxu1 %v31_v3  ;;  %v28_v13 = vpack.c.bf16 %v13_v12, %v12_v11 }
   0x6   :  { %161 = vmatprep.subr.bf16.mxu0 %v30_v5  ;;  %176 = vmatprep.subr.bf16.mxu1 %v30_v5 }
   0x7   :  { %167 = vmatprep.mubr.msk.bf16.mxu0 %vm52_vm0, %v183_v8  ;;  %171 = vmatprep.mubr.msk.bf16.mxu1 %vm52_vm0, %v184_v9 }
   0x9   :  { %162 = vmatpush3.bf16.msra.mxu0 %v30_v5  ;;  %180 = vmatpush3.bf16.msra.mxu1 %v30_v5 }
   0xa   :  { %163 = vmatprep.subr.bf16.mxu0 %v29_v10  ;;  %177 = vmatprep.subr.bf16.mxu1 %v29_v10 }
   0xd   :  { %164 = vmatpush3.bf16.msra.mxu0 %v29_v10  ;;  %181 = vmatpush3.bf16.msra.mxu1 %v29_v10 }
   0xe   :  { %165 = vmatprep.subr.bf16.mxu0 %v28_v13  ;;  %178 = vmatprep.subr.bf16.mxu1 %v28_v13 }
  0x11   :  { %166 = vmatpush3.bf16.msra.mxu0 %v28_v13  ;;  %182 = vmatpush3.bf16.msra.mxu1 %v28_v13 }
  0x14   :  { %168 = vmatmul.mubr.msk.bf16.vlgmr.msra.gmra.mxu0 %vm52_vm0, %v185_v14  ;;  %172 = vmatmul.mubr.msk.bf16.vlgmr.msra.gmra.mxu1 %vm52_vm0, %v186_v15 }
  0xd4   :  { %v169_v16 = vpop.f32.mrf.mxu0  ;;  %v173_v17 = vpop.f32.mrf.mxu1 }
  0xd5   :  { %133 = vst.msk [vmem:[%s276_s2 + $0x10] sm:$0xff] %vm130_vm1, %v169_v16  ;;  %137 = vst.msk [vmem:[%s276_s2 + $0x30] sm:$0xff] %vm130_vm1, %v173_v17 }
  0xd6   :  { %v99_v18 = vpop.f32.mrf.mxu0  ;;  %v115_v19 = vpop.f32.mrf.mxu1 }
  0xd7   :  { %131 = vst.msk [vmem:[%s276_s2] sm:$0xff] %vm130_vm1, %v99_v18  ;;  %135 = vst.msk [vmem:[%s276_s2 + $0x20] sm:$0xff] %vm130_vm1, %v115_v19 }
  0xd8   :  { %v170_v20 = vpop.f32.mrf.mxu0  ;;  %v174_v21 = vpop.f32.mrf.mxu1 }
  0xd9   :  { %134 = vst.msk [vmem:[%s276_s2 + $0x18] sm:$0xff] %vm130_vm1, %v170_v20  ;;  %138 = vst.msk [vmem:[%s276_s2 + $0x38] sm:$0xff] %vm130_vm1, %v174_v21 }
  0xda   :  { %v102_v22 = vpop.f32.mrf.mxu0  ;;  %v118_v23 = vpop.f32.mrf.mxu1 }
  0xdb   :  { %132 = vst.msk [vmem:[%s276_s2 + $0x8] sm:$0xff] %vm130_vm1, %v102_v22  ;;  %136 = vst.msk [vmem:[%s276_s2 + $0x28] sm:$0xff] %vm130_vm1, %v118_v23 }

</bundles_post_ra>
